<compile_context>
chip_gen: v7x
topology: tpu7x:2x2x1
jax: 0.10.0
libtpu: 0.0.40
codegen_flags: <defaults>
</compile_context>

<pallas_src>
import functools
import math

import jax
import jax.numpy as jnp
from jax import lax
from jax.experimental import pallas as pl
from jax.experimental.pallas import tpu as pltpu


# -------------------- configuration (mirrors model/data config) --------------------
MODEL_CONFIG = dict(
    num_filters_per_channel=2,
    num_feats_per_filter=3,
    num_checkpoints=3,
    num_channel_slices=2,
    stop_action_threshold=0.5,
    n_hidden_layers=1,
    n_hidden_layer_units=32,
    policy_nonlinear="relu",
    baseline_n_hidden_layers=1,
    baseline_n_hidden_layer_units=32,
    baseline_nonlinear="relu",
)
DATA_CONFIG = dict(timesteps=8, channels=4, n_classes=3)

HIDDEN_STATE_DIM = (
    DATA_CONFIG["channels"]
    * MODEL_CONFIG["num_filters_per_channel"]
    * MODEL_CONFIG["num_feats_per_filter"]
) + 1 + (MODEL_CONFIG["num_checkpoints"] + 1) * MODEL_CONFIG["num_channel_slices"]  # 33

N_SLICES = MODEL_CONFIG["num_channel_slices"]        # 2
HIDDEN = MODEL_CONFIG["n_hidden_layer_units"]        # 32
STOP_THRESH = MODEL_CONFIG["stop_action_threshold"]  # 0.5

D = HIDDEN_STATE_DIM                                 # 33
H3 = 3 * HIDDEN                                      # 96: fused hidden width
LANES = 128                                          # lane-padded width

# ---- packed input-slab lane layout (one (B, 128) f32 input) ----
IN_U = 0                         # lanes [0, 4): uniforms u0,u1,u0,u1 (duplicated)
IN_X = 2 * N_SLICES              # lanes [4, 37): the 33 hidden-state features

# ---- packed output-slab lane layout (one (B, 128) lane-dense f32 output) ----
OUT_ACT = 0                      # lanes [0, 2): filter_action
OUT_LOGPI = N_SLICES             # lanes [2, 4): log_pi_filter
OUT_STOP = 2 * N_SLICES          # lane  4     : stop_action
OUT_BASE = 2 * N_SLICES + 1      # lane  5     : baseline

# ---- packed bf16 weight-slab row layout: W1 rows [0,128), W2 rows [128,256) ----
ROW_W1 = 0
ROW_W2 = LANES
ROWS_TOTAL = 2 * LANES           # 256


# -------------------- numerically stable helper (in-kernel, f32 on VPU/EUP) ----
def _softplus(x):
    # softplus(x) = log(1 + exp(x)), stable for both signs
    return jnp.maximum(x, 0.0) + jnp.log1p(jnp.exp(-jnp.abs(x)))


# -------------------- the Pallas kernel --------------------
def _rl_policies_kernel(xu_ref, w_ref, b_ref, out_ref, *, stop_logit_thresh):
    xu = xu_ref[...]                                   # (TB, 128) f32: uniforms + x
    w1 = w_ref[ROW_W1:ROW_W1 + LANES, :]               # (128, 128) bf16 fused layer-1
    w2 = w_ref[ROW_W2:ROW_W2 + LANES, :]               # (128, 128) bf16 block-diag layer-2
    b1 = b_ref[0:1, :]                                 # (1, 128) f32
    b2 = b_ref[1:2, :]                                 # (1, 128) f32

    # Fused first layer of all three nets (one MXU push). Uniform lanes [0,4)
    # hit zero weight rows, so they do not perturb the hidden activations.
    h = jnp.dot(xu.astype(jnp.bfloat16), w1,
                preferred_element_type=jnp.float32) + b1
    h = jnp.maximum(h, 0.0)                            # ReLU; padded lanes stay 0

    # Fused second layer (one MXU push). Lane layout of y matches the output
    # slab: [0,2) & [2,4) filter logits (duplicated), 4 stop logit, 5 baseline.
    y = jnp.dot(h.astype(jnp.bfloat16), w2,
                preferred_element_type=jnp.float32) + b2

    # Full-width f32 VPU/EUP math (per-vreg cost identical to narrow slices,
    # but no cross-lane movement). Only the selected lanes are meaningful.
    probs = jax.nn.sigmoid(y)
    action = (xu < probs).astype(jnp.float32)          # Bernoulli: 1{u < p}
    # Bernoulli(p).log_prob(a) = a*log(p) + (1-a)*log(1-p), stable via logits:
    #   log(p) = -softplus(-z),  log(1-p) = -softplus(z)
    log_pi = -(action * _softplus(-y) + (1.0 - action) * _softplus(y))
    # stop: sigmoid(z) >= t  <=>  z >= logit(t)  (monotone; exact at t=0.5 where
    # logit(t)=0; for other t, float rounding of logit(t) can differ on exact-
    # boundary inputs — negligible).
    stop = (y >= stop_logit_thresh).astype(jnp.float32)

    # Assemble the (TB, 128) result in registers and write it with ONE unmasked
    # full-width store. Lanes >= 6 are explicitly zero.
    lanes = lax.broadcasted_iota(jnp.int32, y.shape, 1)
    out = jnp.where(
        lanes < OUT_LOGPI, action,
        jnp.where(lanes < OUT_STOP, log_pi,
                  jnp.where(lanes == OUT_STOP, stop,
                            jnp.where(lanes == OUT_BASE, y, 0.0))))
    out_ref[...] = out


# -------------------- host-side one-time parameter packing --------------------
def pack_params(params):
    """Pack the 12 weight/bias arrays into:
         * one (256, 128) bf16 weight slab (W1 rows [0,128), W2 rows [128,256))
         * one (2, 128) f32 bias slab (row 0 = fused b1, row 1 = fused b2)
    W2 columns are laid out to coincide with the output lanes; the filter head
    is duplicated into lanes [2,4) so log-probs need no lane shift."""
    w1 = jnp.zeros((LANES, LANES), jnp.float32)
    w1_blk = jnp.concatenate(
        [params["f_w1"], params["s_w1"], params["b_w1"]], axis=1)        # (33, 96)
    w1 = w1.at[IN_X:IN_X + D, :H3].set(w1_blk)

    w2 = jnp.zeros((LANES, LANES), jnp.float32)
    w2 = w2.at[0:HIDDEN, OUT_ACT:OUT_ACT + N_SLICES].set(params["f_w2"])
    w2 = w2.at[0:HIDDEN, OUT_LOGPI:OUT_LOGPI + N_SLICES].set(params["f_w2"])  # dup
    w2 = w2.at[HIDDEN:2 * HIDDEN, OUT_STOP:OUT_STOP + 1].set(params["s_w2"])
    w2 = w2.at[2 * HIDDEN:3 * HIDDEN, OUT_BASE:OUT_BASE + 1].set(params["b_w2"])

    w_slab = jnp.concatenate([w1, w2], axis=0).astype(jnp.bfloat16)      # (256, 128)

    b_slab = jnp.zeros((2, LANES), jnp.float32)
    b1 = jnp.concatenate(
        [params["f_b1"], params["s_b1"], params["b_b1"]], axis=1)        # (1, 96)
    b_slab = b_slab.at[0, :H3].set(b1[0])
    b_slab = b_slab.at[1, OUT_ACT:OUT_ACT + N_SLICES].set(params["f_b2"][0])
    b_slab = b_slab.at[1, OUT_LOGPI:OUT_LOGPI + N_SLICES].set(params["f_b2"][0])
    b_slab = b_slab.at[1, OUT_STOP].set(params["s_b2"][0, 0])
    b_slab = b_slab.at[1, OUT_BASE].set(params["b_b2"][0, 0])
    return w_slab, b_slab


def pack_inputs(x, uniforms):
    """Fold Bernoulli uniforms into the x input: lanes [0,2) & [2,4) hold the
    (duplicated) uniforms, lanes [4,37) hold x, the rest is zero."""
    B = x.shape[0]
    pad = jnp.zeros((B, LANES - IN_X - D), jnp.float32)
    return jnp.concatenate(
        [uniforms, uniforms, x.astype(jnp.float32), pad], axis=1)        # (B, 128)


# -------------------- wrapper --------------------
def rl_policies_forward(x, uniforms, w_slab, b_slab):
    """x: (B, 33) f32, uniforms: (B, 2) in [0,1), slabs from pack_params(...).

    Returns (stop_action, filter_action, log_pi_filter, baseline)."""
    B, d = x.shape
    assert d == HIDDEN_STATE_DIM

    xu = pack_inputs(x, uniforms)

    stop_logit_thresh = float(math.log(STOP_THRESH / (1.0 - STOP_THRESH)))
    kernel = functools.partial(_rl_policies_kernel,
                               stop_logit_thresh=stop_logit_thresh)

    # Batch grid: >=512-row tiles for rollout-scale B (≈85% HBM roofline); the
    # weight/bias slabs get constant index_maps so they stay VMEM-resident.
    TB = 512
    if B % TB:
        TB = B   # small / irregular batches: one tile spanning the whole batch
    grid = (B // TB,)

    out = pl.pallas_call(
        kernel,
        out_shape=jax.ShapeDtypeStruct((B, LANES), jnp.float32),
        grid=grid,
        in_specs=[
            pl.BlockSpec((TB, LANES), lambda i: (i, 0)),           # xu: blocked rows
            pl.BlockSpec((ROWS_TOTAL, LANES), lambda i: (0, 0)),   # weights: resident
            pl.BlockSpec((2, LANES), lambda i: (0, 0)),            # biases: resident
        ],
        out_specs=pl.BlockSpec((TB, LANES), lambda i: (i, 0)),
        compiler_params=pltpu.CompilerParams(
            dimension_semantics=("parallel",)),                    # v7x: 2 TCs
        # TODO(synk): for v7x rollout batches, benchmark a (B, 8) output (block
        # last dim == full array dim) to cut output-writeback amplification, and
        # an in-kernel pltpu.prng_seed/prng_random_bits sampling path.
    )(xu, w_slab, b_slab)

    filter_action = out[:, OUT_ACT:OUT_ACT + N_SLICES]
    log_pi = out[:, OUT_LOGPI:OUT_LOGPI + N_SLICES]
    stop_action = out[:, OUT_STOP]      # torch squeezes stop_action
    baseline = out[:, OUT_BASE]         # torch squeezes baseline
    return stop_action, filter_action, log_pi, baseline


# -------------------- deterministic parameter init (xavier_normal_, bias=0.01) ----
def _xavier_normal(key, fan_in, fan_out, gain):
    std = gain * (2.0 / (fan_in + fan_out)) ** 0.5
    return std * jax.random.normal(key, (fan_in, fan_out), dtype=jnp.float32)


def init_params(key):
    gain_relu = 2.0 ** 0.5  # torch.nn.init.calculate_gain('relu')
    keys = jax.random.split(key, 6)
    Dm, H, S = HIDDEN_STATE_DIM, HIDDEN, N_SLICES
    bias = lambda n: jnp.full((1, n), 0.01, jnp.float32)
    return dict(
        # filterPolicyNet: D -> H -> S
        f_w1=_xavier_normal(keys[0], Dm, H, gain_relu), f_b1=bias(H),
        f_w2=_xavier_normal(keys[1], H, S, gain_relu), f_b2=bias(S),
        # stopNet: D -> H -> 1
        s_w1=_xavier_normal(keys[2], Dm, H, gain_relu), s_b1=bias(H),
        s_w2=_xavier_normal(keys[3], H, 1, gain_relu), s_b2=bias(1),
        # baselineNet: D -> H -> 1
        b_w1=_xavier_normal(keys[4], Dm, H, gain_relu), b_b1=bias(H),
        b_w2=_xavier_normal(keys[5], H, 1, gain_relu), b_b2=bias(1),
    )


# -------------------- pure-JAX reference (f32) for a loose numeric check ----
def _reference(x, params):
    def mlp(w1, b1, w2, b2):
        h = jnp.maximum(x @ w1 + b1, 0.0)
        return h @ w2 + b2
    filt_logits = mlp(params["f_w1"], params["f_b1"], params["f_w2"], params["f_b2"])
    stop_logit = mlp(params["s_w1"], params["s_b1"], params["s_w2"], params["s_b2"])
    baseline = mlp(params["b_w1"], params["b_b1"], params["b_w2"], params["b_b2"])
    return filt_logits, stop_logit[:, 0], baseline[:, 0]


# TODO(synk): getRewards/discount_rewards/computeLoss (REINFORCE bookkeeping over
# python lists) are training-loop glue, not part of forward(); not kernelized.

if __name__ == "__main__":
    key = jax.random.PRNGKey(0)
    pkey, xkey, ukey = jax.random.split(key, 3)

    params = init_params(pkey)
    w_slab, b_slab = pack_params(params)   # one-time packing, out of the call path

    B = 2
    x = jax.random.normal(xkey, (B, HIDDEN_STATE_DIM), dtype=jnp.float32)
    # Bernoulli-sampling uniforms generated host-side (kernel stays free of
    # TPU-only PRNG primitives so it also runs under interpret checks).
    u = jax.random.uniform(ukey, (B, N_SLICES), dtype=jnp.float32)

    stop_action, filter_action, log_pi, baseline = rl_policies_forward(
        x, u, w_slab, b_slab)
    jax.block_until_ready((stop_action, filter_action, log_pi, baseline))

    # ---- sanity checks: shapes, value ranges, loose numeric agreement ----
    assert stop_action.shape == (B,)
    assert filter_action.shape == (B, N_SLICES)
    assert log_pi.shape == (B, N_SLICES)
    assert baseline.shape == (B,)
    assert bool(jnp.all((stop_action == 0.0) | (stop_action == 1.0)))
    assert bool(jnp.all((filter_action == 0.0) | (filter_action == 1.0)))
    assert bool(jnp.all(log_pi <= 0.0))
    assert bool(jnp.all(jnp.isfinite(baseline)))

    filt_logits_ref, _, baseline_ref = _reference(x, params)
    # bf16 MXU operands => ~1e-2 absolute slack on order-1 logits.
    assert bool(jnp.all(jnp.abs(baseline - baseline_ref) < 0.1))
    log_pi_ref = -(filter_action * _softplus(-filt_logits_ref)
                   + (1.0 - filter_action) * _softplus(filt_logits_ref))
    assert bool(jnp.all(jnp.abs(log_pi - log_pi_ref) < 0.15))

    print("KERNEL_OK")
</pallas_src>

<mosaic_0001>
module attributes {stable_mosaic.version = 11 : i64} {
  func.func @_rl_policies_kernel(%arg0: i32, %arg1: memref<2x128xf32, #tpu.memory_space<vmem>>, %arg2: memref<256x128xbf16, #tpu.memory_space<vmem>>, %arg3: memref<2x128xf32, #tpu.memory_space<vmem>>, %arg4: memref<2x128xf32, #tpu.memory_space<vmem>>) attributes {dimension_semantics = [#tpu.dimension_semantics<parallel>], iteration_bounds = array<i64: 1>, scalar_prefetch = 0 : i64, scratch_operands = 0 : i64, tpu.core_type = #tpu.core_type<tc>, window_params = [{transform_indices = @transform_0, window_bounds = array<i64: 2, 128>}, {pipeline_mode = #tpu.pipeline_mode<synchronous>, transform_indices = @transform_1, window_bounds = array<i64: 256, 128>}, {pipeline_mode = #tpu.pipeline_mode<synchronous>, transform_indices = @transform_2, window_bounds = array<i64: 2, 128>}, {transform_indices = @transform_3, window_bounds = array<i64: 2, 128>}]} {
    %c0 = arith.constant 0 : index
    %c0_0 = arith.constant 0 : index
    %0 = vector.load %arg1[%c0, %c0_0] : memref<2x128xf32, #tpu.memory_space<vmem>>, vector<2x128xf32>
    %c0_1 = arith.constant 0 : index
    %c0_2 = arith.constant 0 : index
    %1 = vector.load %arg2[%c0_1, %c0_2] : memref<256x128xbf16, #tpu.memory_space<vmem>>, vector<128x128xbf16>
    %c128 = arith.constant 128 : index
    %c0_3 = arith.constant 0 : index
    %2 = vector.load %arg2[%c128, %c0_3] : memref<256x128xbf16, #tpu.memory_space<vmem>>, vector<128x128xbf16>
    %c0_4 = arith.constant 0 : index
    %c0_5 = arith.constant 0 : index
    %3 = vector.load %arg3[%c0_4, %c0_5] : memref<2x128xf32, #tpu.memory_space<vmem>>, vector<1x128xf32>
    %c1 = arith.constant 1 : index
    %c0_6 = arith.constant 0 : index
    %4 = vector.load %arg3[%c1, %c0_6] : memref<2x128xf32, #tpu.memory_space<vmem>>, vector<1x128xf32>
    %5 = arith.truncf %0 : vector<2x128xf32> to vector<2x128xbf16>
    %cst = arith.constant dense<0.000000e+00> : vector<2x128xf32>
    %6 = tpu.matmul %5, %1, %cst {dimension_numbers = #tpu.dot_dimension_numbers<[1], [0], [0], [1], [0, 0, 1, 1], [], []>} : vector<2x128xbf16>, vector<128x128xbf16>, vector<2x128xf32> -> vector<2x128xf32>
    %7 = vector.broadcast %3 : vector<1x128xf32> to vector<2x128xf32>
    %8 = arith.addf %6, %7 : vector<2x128xf32>
    %cst_7 = arith.constant 0.000000e+00 : f32
    %9 = vector.broadcast %cst_7 : f32 to vector<2x128xf32>
    %10 = arith.maximumf %8, %9 : vector<2x128xf32>
    %11 = arith.truncf %10 : vector<2x128xf32> to vector<2x128xbf16>
    %cst_8 = arith.constant dense<0.000000e+00> : vector<2x128xf32>
    %12 = tpu.matmul %11, %2, %cst_8 {dimension_numbers = #tpu.dot_dimension_numbers<[1], [0], [0], [1], [0, 0, 1, 1], [], []>} : vector<2x128xbf16>, vector<128x128xbf16>, vector<2x128xf32> -> vector<2x128xf32>
    %13 = vector.broadcast %4 : vector<1x128xf32> to vector<2x128xf32>
    %14 = arith.addf %12, %13 : vector<2x128xf32>
    %15 = arith.negf %14 : vector<2x128xf32>
    %16 = math.exp %15 : vector<2x128xf32>
    %cst_9 = arith.constant 1.000000e+00 : f32
    %17 = vector.broadcast %cst_9 : f32 to vector<2x128xf32>
    %18 = arith.addf %17, %16 : vector<2x128xf32>
    %19 = arith.divf %17, %18 : vector<2x128xf32>
    %20 = arith.cmpf olt, %0, %19 : vector<2x128xf32>
    %21 = arith.extui %20 : vector<2x128xi1> to vector<2x128xi32>
    %22 = arith.sitofp %21 : vector<2x128xi32> to vector<2x128xf32>
    %cst_10 = arith.constant 0.000000e+00 : f32
    %23 = vector.broadcast %cst_10 : f32 to vector<2x128xf32>
    %24 = arith.subf %23, %14 : vector<2x128xf32>
    %cst_11 = arith.constant 0.000000e+00 : f32
    %25 = vector.broadcast %cst_11 : f32 to vector<2x128xf32>
    %26 = arith.maximumf %24, %25 : vector<2x128xf32>
    %27 = math.absf %24 : vector<2x128xf32>
    %cst_12 = arith.constant 0.000000e+00 : f32
    %28 = vector.broadcast %cst_12 : f32 to vector<2x128xf32>
    %29 = arith.subf %28, %27 : vector<2x128xf32>
    %30 = math.exp %29 : vector<2x128xf32>
    %31 = math.log1p %30 : vector<2x128xf32>
    %32 = arith.addf %26, %31 : vector<2x128xf32>
    %33 = arith.mulf %22, %32 : vector<2x128xf32>
    %cst_13 = arith.constant 1.000000e+00 : f32
    %34 = vector.broadcast %cst_13 : f32 to vector<2x128xf32>
    %35 = arith.subf %34, %22 : vector<2x128xf32>
    %cst_14 = arith.constant 0.000000e+00 : f32
    %36 = vector.broadcast %cst_14 : f32 to vector<2x128xf32>
    %37 = arith.maximumf %14, %36 : vector<2x128xf32>
    %38 = math.absf %14 : vector<2x128xf32>
    %cst_15 = arith.constant 0.000000e+00 : f32
    %39 = vector.broadcast %cst_15 : f32 to vector<2x128xf32>
    %40 = arith.subf %39, %38 : vector<2x128xf32>
    %41 = math.exp %40 : vector<2x128xf32>
    %42 = math.log1p %41 : vector<2x128xf32>
    %43 = arith.addf %37, %42 : vector<2x128xf32>
    %44 = arith.mulf %35, %43 : vector<2x128xf32>
    %45 = arith.addf %33, %44 : vector<2x128xf32>
    %cst_16 = arith.constant 0.000000e+00 : f32
    %46 = vector.broadcast %cst_16 : f32 to vector<2x128xf32>
    %47 = arith.subf %46, %45 : vector<2x128xf32>
    %cst_17 = arith.constant 0.000000e+00 : f32
    %48 = vector.broadcast %cst_17 : f32 to vector<2x128xf32>
    %49 = arith.cmpf oge, %14, %48 : vector<2x128xf32>
    %50 = arith.extui %49 : vector<2x128xi1> to vector<2x128xi32>
    %51 = arith.sitofp %50 : vector<2x128xi32> to vector<2x128xf32>
    %52 = tpu.iota {dimensions = array<i32: 1>} : vector<2x128xi32>
    %c2_i32 = arith.constant 2 : i32
    %53 = vector.broadcast %c2_i32 : i32 to vector<2x128xi32>
    %54 = arith.cmpi slt, %52, %53 : vector<2x128xi32>
    %c4_i32 = arith.constant 4 : i32
    %55 = vector.broadcast %c4_i32 : i32 to vector<2x128xi32>
    %56 = arith.cmpi slt, %52, %55 : vector<2x128xi32>
    %c4_i32_18 = arith.constant 4 : i32
    %57 = vector.broadcast %c4_i32_18 : i32 to vector<2x128xi32>
    %58 = arith.cmpi eq, %52, %57 : vector<2x128xi32>
    %c5_i32 = arith.constant 5 : i32
    %59 = vector.broadcast %c5_i32 : i32 to vector<2x128xi32>
    %60 = arith.cmpi eq, %52, %59 : vector<2x128xi32>
    %cst_19 = arith.constant 0.000000e+00 : f32
    %61 = vector.broadcast %cst_19 : f32 to vector<2x128xf32>
    %62 = arith.select %60, %14, %61 : vector<2x128xi1>, vector<2x128xf32>
    %63 = arith.select %58, %51, %62 : vector<2x128xi1>, vector<2x128xf32>
    %64 = arith.select %56, %47, %63 : vector<2x128xi1>, vector<2x128xf32>
    %65 = arith.select %54, %22, %64 : vector<2x128xi1>, vector<2x128xf32>
    %c0_20 = arith.constant 0 : index
    %c0_21 = arith.constant 0 : index
    %66 = vector.load %arg4[%c0_20, %c0_21] : memref<2x128xf32, #tpu.memory_space<vmem>>, vector<2x128xf32>
    tpu.vector_store %arg4[%c0_20, %c0_21], %65 {strides = array<i32>} : memref<2x128xf32, #tpu.memory_space<vmem>>, vector<2x128xf32>,
    return
  }
  func.func @transform_0(%arg0: i32) -> (i32, i32) {
    %c0_i32 = arith.constant 0 : i32
    %c0_i32_0 = arith.constant 0 : i32
    return %arg0, %c0_i32 : i32, i32
  }
  func.func @transform_1(%arg0: i32) -> (i32, i32) {
    %c0_i32 = arith.constant 0 : i32
    %c0_i32_0 = arith.constant 0 : i32
    %c0_i32_1 = arith.constant 0 : i32
    return %c0_i32, %c0_i32_0 : i32, i32
  }
  func.func @transform_2(%arg0: i32) -> (i32, i32) {
    %c0_i32 = arith.constant 0 : i32
    %c0_i32_0 = arith.constant 0 : i32
    %c0_i32_1 = arith.constant 0 : i32
    return %c0_i32, %c0_i32_0 : i32, i32
  }
  func.func @transform_3(%arg0: i32) -> (i32, i32) {
    %c0_i32 = arith.constant 0 : i32
    %c0_i32_0 = arith.constant 0 : i32
    return %arg0, %c0_i32 : i32, i32
  }
}

</mosaic_0001>

<bundles_post_ra>
// kernel: tpu_custom_call.1
= control target key start
LH: loop header
LB: loop body
LE: loop exit
PB: predicated region body
PF: predicated region fallthrough
CT: control target
= control target key end

     0   :  { %8 = vsyncpa [#allocation3], 0  ;;  %s626_s0 = inlined_call_operand.hbm [shape: f32[2,128], index: 0, kind: input, shape index: {}]   ;;  %s627_s1 = inlined_call_operand.hbm [shape: bf16[256,128], index: 1, kind: input, shape index: {}]   ;;  %s628_s2 = inlined_call_operand.vmem [shape: f32[2,128], index: 2, kind: input, shape index: {}]   ;;  %s629_s3 = inlined_call_operand.hbm [shape: f32[2,128], index: 3, kind: output, shape index: {}]  }
   0x1   :  { %9 = vsyncpa [#allocation6], 0 }
   0x2   :  { %10 = vsyncpa [#allocation4], 0  ;;  %s525_s12 = smov [#allocation2]   ;;  %s526_s14 = smov [#allocation5]  }
   0x3   :  { %s17_s13 = sshll.u32 %s525_s12, 4  ;;  %s26_s15 = sshll.u32 %s526_s14, 4  ;;  %s18_s13 = int_to_ptr.vmem [resolvable:$true] %s17_s13  ;;  %s552_s15 = int_to_ptr.vmem [resolvable:$true] %s26_s15 }
   0x4   :  { %s453_s18 = scalar_lea.hbm %s626_s0, 32 }
   0x5   :  { %p454_p0 = scmp.ne.s32.totalorder %s626_s0, %s453_s18  ;;  %p457_p1 = scmp.lt.u32.totalorder %s453_s18, %s626_s0 }
   0x7   :  { %p459_p2 = pnand %p457_p1, %p454_p0 }
   0x9   :  { %462 = shalt.err (!%p459_p2)
}
   0xa   :  { %s463_s23 = scalar_lea.vmem %s18_s13, 32  ;;  %p468_p4 = scmp.lt.s32.totalorder %s18_s13, %s18_s13 }
   0xb   :  { %p464_p3 = scmp.ne.s32.totalorder %s18_s13, %s463_s23  ;;  %p469_p5 = scmp.lt.s32.totalorder %s463_s23, %s463_s23 }
   0xd   :  { %p470_p6 = por %p469_p5, %p468_p4 }
   0xf   :  { %p471_p7 = pnand %p470_p6, %p464_p3 }
  0x11   :  { %474 = shalt.err (!%p471_p7)
}
  0x12   :  { %20 = dma.hbm_to_vmem [thread:$0]  %s626_s0, 32, %s18_s13, [#allocation3]  }
  0x13   :  { %s475_s28 = scalar_lea.hbm %s627_s1, 2048 }
  0x14   :  { %p476_p8 = scmp.ne.s32.totalorder %s627_s1, %s475_s28  ;;  %p479_p9 = scmp.lt.u32.totalorder %s475_s28, %s627_s1 }
  0x16   :  { %p481_p10 = pnand %p479_p9, %p476_p8 }
  0x18   :  { %484 = shalt.err (!%p481_p10)
}
  0x19   :  { %s485_s6 = scalar_lea.vmem %s552_s15, 2048  ;;  %p490_p12 = scmp.lt.s32.totalorder %s552_s15, %s552_s15 }
  0x1a   :  { %p486_p11 = scmp.ne.s32.totalorder %s552_s15, %s485_s6  ;;  %p491_p13 = scmp.lt.s32.totalorder %s485_s6, %s485_s6 }
  0x1c   :  { %p492_p0 = por %p491_p13, %p490_p12 }
  0x1e   :  { %p493_p1 = pnand %p492_p0, %p486_p11 }
  0x20   :  { %496 = shalt.err (!%p493_p1)
}
  0x21   :  { %s527_s0 = smov 64   ;;  %s528_s7 = smov 4  }
  0x22   :  { %32 = dma.hbm_to_vmem [thread:$0]  %s627_s1, 2048, %s552_s15, [#allocation6], %s527_s0, %s527_s0, %s528_s7  }
  0x23   :  { %519 = dma.done.wait [#allocation3], 32  }
  0x24   :  { %520 = vsyncadd [#allocation3], 4294967264 }
  0x25   :  { %521 = dma.done.wait [#allocation6], 2048  }
  0x26   :  { %522 = vsyncadd [#allocation6], 4294965248  ;;  %v529_v0 = vmov 0.0   ;;  %vm530_vm0 = vmmov 0   ;;  %v425_v1 = vld [vmem:[#allocation5] sm:$0xff]   ;;  %v426_v2 = vld [vmem:[#allocation5 + $0x8] sm:$0xff]   ;;  %v312_v52 = vlaneseq }
  0x27   :  { %378 = vmatprep.subr.bf16.mxu0 %v529_v0  ;;  %394 = vmatprep.mubr.msk.bf16.mxu0 %vm530_vm0, %v529_v0  ;;  %v427_v3 = vld [vmem:[#allocation5 + $0x10] sm:$0xff]   ;;  %v433_v4 = vld [vmem:[#allocation5 + $0x40] sm:$0xff]   ;;  %v428_v5 = vld [vmem:[#allocation5 + $0x18] sm:$0xff]  }
  0x28   :  { %398 = vmatprep.subr.bf16.mxu1 %v529_v0  ;;  %414 = vmatprep.mubr.msk.bf16.mxu1 %vm530_vm0, %v529_v0  ;;  %v434_v6 = vld [vmem:[#allocation5 + $0x48] sm:$0xff]   ;;  %v429_v7 = vld [vmem:[#allocation5 + $0x20] sm:$0xff]   ;;  %v435_v8 = vld [vmem:[#allocation5 + $0x50] sm:$0xff]   ;;  %v313_v60 = vand.u32 127, %v312_v52 }
  0x29   :  { %379 = vmatpush3.bf16.msra.mxu0 %v425_v1  ;;  %399 = vmatpush3.bf16.msra.mxu1 %v433_v4  ;;  %v430_v9 = vld [vmem:[#allocation5 + $0x28] sm:$0xff]   ;;  %v436_v10 = vld [vmem:[#allocation5 + $0x58] sm:$0xff]   ;;  %v431_v11 = vld [vmem:[#allocation5 + $0x30] sm:$0xff]  }
  0x2a   :  { %380 = vmatprep.subr.bf16.mxu0 %v529_v0  ;;  %400 = vmatprep.subr.bf16.mxu1 %v529_v0  ;;  %v437_v12 = vld [vmem:[#allocation5 + $0x60] sm:$0xff]   ;;  %v432_v13 = vld [vmem:[#allocation5 + $0x38] sm:$0xff]   ;;  %v438_v15 = vld [vmem:[#allocation5 + $0x68] sm:$0xff]   ;;  %vm317_vm5 = vcmp.eq.s32.totalorder %v313_v60, 5  ;;  %vm316_vm6 = vcmp.eq.s32.totalorder %v313_v60, 4  ;;  %vm315_vm7 = vcmp.lt.s32.totalorder %v313_v60, 4 }
  0x2b   :  { %v597_v14 = vld [vmem:[#allocation2] sm:$0x3]  ;;  %v439_v17 = vld [vmem:[#allocation5 + $0x70] sm:$0xff]   ;;  %vm314_vm8 = vcmp.lt.s32.totalorder %v313_v60, 2 }
  0x2c   :  { %v77_v16 = vpack.c.bf16 %v597_v14, %v597_v14  ;;  %v440_v18 = vld [vmem:[#allocation5 + $0x78] sm:$0xff]  }
  0x2d   :  { %381 = vmatpush3.bf16.msra.mxu0 %v426_v2  ;;  %401 = vmatpush3.bf16.msra.mxu1 %v434_v6  ;;  %v339_v19 = vld [vmem:[%s628_s2] ss:$0 sm:$0xff]  ;;  %v348_v27 = vld [vmem:[%s628_s2 + $0x1] ss:$0 sm:$0xff]  ;;  %s531_s2 = smov [#allocation7]  }
  0x2e   :  { %382 = vmatprep.subr.bf16.mxu0 %v529_v0  ;;  %402 = vmatprep.subr.bf16.mxu1 %v529_v0  ;;  %s329_s13 = sshll.u32 %s531_s2, 4  ;;  %s330_s13 = int_to_ptr.vmem [resolvable:$true] %s329_s13 }
  0x2f   :  { %s497_s14 = scalar_lea.vmem %s330_s13, 32  ;;  %p502_p3 = scmp.lt.s32.totalorder %s330_s13, %s330_s13 }
  0x30   :  { %p498_p2 = scmp.ne.s32.totalorder %s330_s13, %s497_s14  ;;  %p503_p4 = scmp.lt.s32.totalorder %s497_s14, %s497_s14 }
  0x31   :  { %383 = vmatpush3.bf16.msra.mxu0 %v427_v3  ;;  %403 = vmatpush3.bf16.msra.mxu1 %v435_v8 }
  0x32   :  { %384 = vmatprep.subr.bf16.mxu0 %v529_v0  ;;  %404 = vmatprep.subr.bf16.mxu1 %v529_v0  ;;  %p504_p5 = por %p503_p4, %p502_p3 }
  0x34   :  { %p505_p6 = pnand %p504_p5, %p498_p2 }
  0x35   :  { %385 = vmatpush3.bf16.msra.mxu0 %v428_v5  ;;  %405 = vmatpush3.bf16.msra.mxu1 %v436_v10 }
  0x36   :  { %386 = vmatprep.subr.bf16.mxu0 %v529_v0  ;;  %406 = vmatprep.subr.bf16.mxu1 %v529_v0 }
  0x39   :  { %387 = vmatpush3.bf16.msra.mxu0 %v429_v7  ;;  %407 = vmatpush3.bf16.msra.mxu1 %v437_v12 }
  0x3a   :  { %388 = vmatprep.subr.bf16.mxu0 %v529_v0  ;;  %408 = vmatprep.subr.bf16.mxu1 %v529_v0 }
  0x3d   :  { %389 = vmatpush3.bf16.msra.mxu0 %v430_v9  ;;  %409 = vmatpush3.bf16.msra.mxu1 %v438_v15 }
  0x3e   :  { %390 = vmatprep.subr.bf16.mxu0 %v529_v0  ;;  %410 = vmatprep.subr.bf16.mxu1 %v529_v0 }
  0x41   :  { %391 = vmatpush3.bf16.msra.mxu0 %v431_v11  ;;  %411 = vmatpush3.bf16.msra.mxu1 %v439_v17 }
  0x42   :  { %392 = vmatprep.subr.bf16.mxu0 %v529_v0  ;;  %412 = vmatprep.subr.bf16.mxu1 %v529_v0 }
  0x45   :  { %393 = vmatpush3.bf16.msra.mxu0 %v432_v13  ;;  %413 = vmatpush3.bf16.msra.mxu1 %v440_v18 }
  0x48   :  { %395 = vmatmul.mubr.bf16.vlgmr.msra.gmra.mrb[0].mxu0 %v77_v16 }
 0x11b   :  { %v164_v20 = vpop.f32.mrb[0].mxu0 }
 0x11c   :  { %v165_v21 = vadd.f32 %v339_v19, %v164_v20  ;;  %v396_v22 = vpop.f32.mrb[1].mxu0 }
 0x11d   :  { %v167_v23 = vpop.f32.mrb[2].mxu0 }
 0x11e   :  { %v170_v24 = vmax.f32 %v165_v21, 0.0  ;;  %v397_v25 = vpop.f32.mrb[3].mxu0 }
 0x120   :  { %v171_v26 = vpack.c.bf16 %v170_v24, %v170_v24 }
 0x122   :  { %415 = vmatmul.mubr.bf16.vlgmr.msra.gmra.mrb[0].mxu1 %v171_v26 }
 0x1f5   :  { %v258_v28 = vpop.f32.mrb[0].mxu1 }
 0x1f6   :  { %v259_v29 = vadd.f32 %v348_v27, %v258_v28  ;;  %v416_v30 = vpop.f32.mrb[1].mxu1 }
 0x1f7   :  { %v261_v31 = vpop.f32.mrb[2].mxu1 }
 0x1f8   :  { %v357_v32 = vmul.f32 -1.442695, %v259_v29  ;;  %v292_v33 = vand.u32 2147483647, %v259_v29  ;;  %v417_v34 = vpop.f32.mrb[3].mxu1  ;;  %v273_v35 = vsub.f32 0.0, %v259_v29 }
 0x1f9   :  { %v291_v59 = vmax.f32 %v259_v29, 0.0  ;;  %vm309_vm4 = vcmp.ge.f32.partialorder %v259_v29, 0.0  ;;  %v318_v11 = vsel %vm317_vm5, %v259_v29, 0.0 }
 0x1fa   :  { %441 = vpow2.f32 %v357_v32  ;;  %v293_v36 = vsub.f32 0.0, %v292_v33  ;;  %v275_v37 = vand.u32 2147483647, %v273_v35  ;;  %v274_v2 = vmax.f32 %v273_v35, 0.0 }
 0x1fb   :  { %v359_v10 = vsel %vm309_vm4, 1.0, %v529_v0 }
 0x1fc   :  { %v294_v38 = vmul.f32 1.442695, %v293_v36  ;;  %v276_v39 = vsub.f32 0.0, %v275_v37  ;;  %v319_v13 = vsel %vm316_vm6, %v359_v10, %v318_v11 }
 0x1fe   :  { %443 = vpow2.f32 %v294_v38  ;;  %v277_v40 = vmul.f32 1.442695, %v276_v39 }
 0x200   :  { %445 = vpow2.f32 %v277_v40 }
 0x204   :  { %v442_v41 = vpop.eup %441 }
 0x205   :  { %v267_v42 = vadd.f32 1.0, %v442_v41 }
 0x207   :  { %447 = vrcp.f32 %v267_v42 }
 0x208   :  { %v444_v43 = vpop.eup %443 }
 0x209   :  { %v296_v44 = vadd.f32 1.0, %v444_v43  ;;  %v299_v47 = vmul.f32 -0.5, %v444_v43  ;;  %v302_v51 = vand.u32 2147483647, %v444_v43 }
 0x20a   :  { %v446_v45 = vpop.eup %445 }
 0x20b   :  { %v279_v46 = vadd.f32 1.0, %v446_v45  ;;  %449 = vlog2.f32 %v296_v44  ;;  %v282_v48 = vmul.f32 -0.5, %v446_v45  ;;  %v300_v50 = vadd.f32 1.0, %v299_v47 }
 0x20c   :  { %v285_v55 = vand.u32 2147483647, %v446_v45  ;;  %vm303_vm2 = vcmp.lt.f32.partialorder %v302_v51, 0.0004427343 }
 0x20d   :  { %451 = vlog2.f32 %v279_v46  ;;  %v283_v53 = vadd.f32 1.0, %v282_v48  ;;  %v301_v57 = vmul.f32 %v444_v43, %v300_v50 }
 0x20e   :  { %vm286_vm3 = vcmp.lt.f32.partialorder %v285_v55, 0.0004427343 }
 0x20f   :  { %v284_v63 = vmul.f32 %v446_v45, %v283_v53 }
 0x211   :  { %v448_v49 = vpop.eup %447 }
 0x212   :  { %vm270_vm1 = vcmp.lt.f32.partialorder %v597_v14, %v448_v49 }
 0x213   :  { %v358_v61 = vsel %vm270_vm1, 1.0, %v529_v0 }
 0x214   :  { %v290_v6 = vsub.f32 1.0, %v358_v61 }
 0x215   :  { %v450_v54 = vpop.eup %449 }
 0x216   :  { %v298_v56 = vmul.f32 0.6931472, %v450_v54 }
 0x217   :  { %v452_v58 = vpop.eup %451 }
 0x218   :  { %v281_v62 = vmul.f32 0.6931472, %v452_v58  ;;  %v304_v1 = vsel %vm303_vm2, %v301_v57, %v298_v56 }
 0x219   :  { %v305_v3 = vadd.f32 %v304_v1, %v291_v59 }
 0x21a   :  { %v287_v4 = vsel %vm286_vm3, %v284_v63, %v281_v62 }
 0x21b   :  { %v288_v5 = vadd.f32 %v287_v4, %v274_v2  ;;  %v306_v8 = vmul.f32 %v305_v3, %v290_v6 }
 0x21d   :  { %v289_v7 = vmul.f32 %v358_v61, %v288_v5 }
 0x21f   :  { %v307_v9 = vadd.f32 %v306_v8, %v289_v7 }
 0x221   :  { %v308_v12 = vsub.f32 0.0, %v307_v9 }
 0x223   :  { %v320_v14 = vsel %vm315_vm7, %v308_v12, %v319_v13 }
 0x224   :  { %v321_v15 = vsel %vm314_vm8, %v358_v61, %v320_v14 }
 0x225   :  { %322 = vst [vmem:[#allocation7] sm:$0x3] %v321_v15 }
 0x226   :  { %508 = shalt.err (!%p505_p6)
}
 0x227   :  { %s509_s17 = scalar_lea.hbm %s629_s3, 32 }
 0x228   :  { %p510_p7 = scmp.ne.s32.totalorder %s629_s3, %s509_s17  ;;  %p513_p8 = scmp.lt.u32.totalorder %s509_s17, %s629_s3 }
 0x22a   :  { %p515_p9 = pnand %p513_p8, %p510_p7 }
 0x22c   :  { %518 = shalt.err (!%p515_p9)
}
 0x22d   :  { %332 = dma.vmem_to_hbm [thread:$0]  %s330_s13, 32, %s629_s3, [#allocation4]  }
 0x22e   :  { %523 = dma.done.wait [#allocation4], 32  }
 0x22f   :  { %524 = vsyncadd [#allocation4], 4294967264 }
 0x230   :  { %336 = vsyncpa [#allocation3], 1 }
 0x231   :  { %337 = vsyncpa [#allocation6], 1 }
 0x232   :  { %338 = vsyncpa [#allocation4], 1 }

</bundles_post_ra>
